<compile_context>
chip_gen: v7x
topology: tpu7x:2x2x1
jax: 0.10.0
libtpu: 0.0.40
codegen_flags: <defaults>
</compile_context>

<pallas_src>
import numpy as np
import jax
import jax.numpy as jnp
from jax.experimental import pallas as pl
from jax.experimental.pallas import tpu as pltpu

ENC_DIM = 128  # real module: self.enc_dim = 256*4*2 = 2048; scaled down for this synthetic test


# -------------------------------------------------------------------------
# helpers (plain JAX / numpy glue)
# -------------------------------------------------------------------------
def bilinear_matrix(in_size, out_size):
    """1-D resize matrix matching F.interpolate(mode='bilinear', align_corners=False)."""
    scale = in_size / out_size
    src = (np.arange(out_size, dtype=np.float64) + 0.5) * scale - 0.5
    src = np.clip(src, 0.0, in_size - 1)
    i0 = np.floor(src).astype(np.int64)
    i1 = np.minimum(i0 + 1, in_size - 1)
    frac = (src - i0).astype(np.float32)
    m = np.zeros((out_size, in_size), dtype=np.float32)
    m[np.arange(out_size), i0] += 1.0 - frac
    m[np.arange(out_size), i1] += frac
    return m


def _round_up(x, m):
    return ((x + m - 1) // m) * m


def _divisors_desc(n, cap=None):
    cap = n if cap is None else min(n, cap)
    return [d for d in range(cap, 0, -1) if n % d == 0]


def _vmem_limit_bytes():
    """Per-generation scoped-VMEM limit: ~48 MiB on v7x (64 MiB phys), ~96 MiB on v5e/v6e."""
    cap = 64 * 1024 * 1024  # conservative default = v7x per-TC physical VMEM
    try:
        info = pltpu.get_tpu_info()
        cap = int(getattr(info, "vmem_capacity_bytes", cap))
    except Exception:
        pass
    return min((cap * 3) // 4, 100 * 1024 * 1024)


def _choose_tiles(N, CHWp, LHW, C, Cout, budget_bytes):
    """VMEM-budget-aware (tn, t_cout).

    t_cout is kept a lane-dense multiple of 128 (preferring 256 = v6e/v7x MXU N width) or the
    full Cout; within a t_cout choice, tn is maximized (shrinking tn before t_cout, per review).
    """
    BF, F32, DBL = 2, 4, 2  # bf16 bytes, f32 bytes, double-buffering factor

    def step_bytes(tn, t_cout):
        blocks = DBL * (
            tn * CHWp * C * BF            # crop block
            + tn * LHW * C * BF           # loc block
            + 2 * C * t_cout * BF         # wg + wl halves
            + t_cout * F32                # bias row
            + tn * LHW * t_cout * BF      # bf16 output block
            + LHW * CHWp * BF             # R (grid-invariant, still 2 buffers)
        )
        scratch = (tn * LHW * t_cout      # f32 local-GEMM result
                   + tn * CHWp * t_cout   # f32 global-GEMM result
                   + LHW * t_cout) * F32  # f32 per-sample upsample
        scratch += tn * CHWp * t_cout * BF  # bf16 copy of g
        return blocks + scratch

    cout_cands = [d for d in _divisors_desc(Cout) if d % 128 == 0 or d == Cout]
    if not cout_cands:
        cout_cands = [Cout]
    cout_cands.sort(key=lambda d: (0 if d % 256 == 0 else 1, -d))

    for t_cout in cout_cands:
        feasible = [d for d in _divisors_desc(N, cap=16)
                    if step_bytes(d, t_cout) <= budget_bytes]
        if not feasible:
            continue
        if Cout // t_cout >= 2:
            return feasible[0], t_cout          # megacore already has the Cout axis
        multi = [d for d in feasible if N // d >= 2]
        return (multi[0] if multi else feasible[0]), t_cout

    # nothing fits the budget: fall back to the smallest legal tiles
    return 1, cout_cands[-1]


# -------------------------------------------------------------------------
# Pallas kernel: 1x1-conv halves on the *small* pixel counts, bilinear upsample of the
# global branch in bf16, local branch + bias written directly into the output block.
# -------------------------------------------------------------------------
def g2l_fusion_kernel(r_ref, crop_ref, loc_ref, wg_ref, wl_ref, b_ref, out_ref):
    # r_ref   : (LHW, CHWp)       bf16  combined bilinear upsample matrix (grid-invariant)
    # crop_ref: (TN, CHWp, C)     bf16  cropped global features (pixel-major, channels-last)
    # loc_ref : (TN, LHW, C)      bf16  local features
    # wg_ref  : (C, TCout)        bf16  1x1-conv weight half for the (resized) global branch
    # wl_ref  : (C, TCout)        bf16  1x1-conv weight half for the local branch
    # b_ref   : (1, TCout)        f32   conv bias slab
    # out_ref : (TN, LHW, TCout)  bf16
    tn, chw, c = crop_ref.shape
    lhw = loc_ref.shape[1]
    tcout = wg_ref.shape[1]

    # ---- local branch + bias, written straight into the output (no big f32 temp held) ----
    loc2d = loc_ref[...].reshape(tn * lhw, c)                                  # view
    l = jnp.dot(loc2d, wl_ref[...], preferred_element_type=jnp.float32)        # (TN*LHW, TCout)
    out_ref[...] = (l + b_ref[...]).reshape(tn, lhw, tcout).astype(out_ref.dtype)

    # ---- global branch: channel GEMM on the small CHW pixel count (TN folded into M) ----
    crop2d = crop_ref[...].reshape(tn * chw, c)                                # view (CHWp % 8 == 0)
    g = jnp.dot(crop2d, wg_ref[...], preferred_element_type=jnp.float32)       # (TN*CHWp, TCout)
    g = g.astype(jnp.bfloat16).reshape(tn, chw, tcout)

    # ---- cheap bilinear upsample, accumulated into out_ref per sample (bf16 MXU fast path) ----
    # TODO(synk): R has only 4 nonzeros/row; a separable 2-tap row/col lerp on the VPU
    # (static slices + FMAs) would avoid the padded K=CHW MXU contraction entirely.
    r = r_ref[...]
    for i in range(tn):
        up = jnp.dot(r, g[i], preferred_element_type=jnp.float32)              # (LHW, TCout) f32
        out_ref[i] = (out_ref[i] + up).astype(out_ref.dtype)


def g2l_fusion_pallas(R, crops, loc, w_g, w_l, bias):
    # R: (LHW, CHW) f32 | crops: (N, CHW, C) bf16 | loc: (N, LHW, C) bf16
    # w_g/w_l: (C, Cout) bf16 | bias: (1, Cout) f32  ->  (N, LHW, Cout) bf16
    N, CHW, C = crops.shape
    _, LHW, _ = loc.shape
    Cout = w_g.shape[1]

    # Pad CHW to a sublane multiple so in-kernel reshapes are pure views (zero pad rows/cols
    # contribute nothing to either GEMM).
    CHWp = _round_up(CHW, 8)
    if CHWp != CHW:
        crops = jnp.pad(crops, ((0, 0), (0, CHWp - CHW), (0, 0)))
        R = jnp.pad(R, ((0, 0), (0, CHWp - CHW)))
    R = R.astype(jnp.bfloat16)

    vmem_limit = _vmem_limit_bytes()
    tn, t_cout = _choose_tiles(N, CHWp, LHW, C, Cout, budget_bytes=int(vmem_limit * 0.8))

    # Cout axis innermost so the big crop/loc activation blocks stay VMEM-resident across
    # Cout tiles (weights << activations).
    grid = (N // tn, Cout // t_cout)
    return pl.pallas_call(
        g2l_fusion_kernel,
        out_shape=jax.ShapeDtypeStruct((N, LHW, Cout), jnp.bfloat16),
        grid_spec=pltpu.PrefetchScalarGridSpec(
            num_scalar_prefetch=0,
            grid=grid,
            in_specs=[
                pl.BlockSpec((LHW, CHWp), lambda n, co: (0, 0)),
                pl.BlockSpec((tn, CHWp, C), lambda n, co: (n, 0, 0)),
                pl.BlockSpec((tn, LHW, C), lambda n, co: (n, 0, 0)),
                pl.BlockSpec((C, t_cout), lambda n, co: (0, co)),
                pl.BlockSpec((C, t_cout), lambda n, co: (0, co)),
                pl.BlockSpec((1, t_cout), lambda n, co: (0, co)),
            ],
            out_specs=pl.BlockSpec((tn, LHW, t_cout), lambda n, co: (n, 0, co)),
        ),
        compiler_params=pltpu.CompilerParams(
            dimension_semantics=("parallel", "parallel"),
            vmem_limit_bytes=vmem_limit,
        ),
    )(R, crops, loc, w_g, w_l, bias)


def g2l_fusion_reference(R, crops, loc, w_g, w_l, bias):
    # Pure-JAX f32 reference on the same (bf16-rounded) inputs.
    crops = crops.astype(jnp.float32)
    loc = loc.astype(jnp.float32)
    w_g = w_g.astype(jnp.float32)
    w_l = w_l.astype(jnp.float32)
    resized = jnp.einsum('pk,nkc->npc', R, crops)
    return (jnp.einsum('npc,cd->npd', resized, w_g)
            + jnp.einsum('npc,cd->npd', loc, w_l)
            + bias)


# -------------------------------------------------------------------------
# CoG2LNet (JAX/Pallas)
# -------------------------------------------------------------------------
class CoG2LNetPallas:
    def __init__(self, key, enc_dim=ENC_DIM, backbone_stride=4):
        self.enc_dim = enc_dim
        self.stride = backbone_stride
        k1, k2, k3, k4 = jax.random.split(key, 4)
        # TODO(synk): ResNets.create_model backbone is not defined in the module source;
        # represented by a deterministic avg-pool + 1x1 channel-projection + ReLU stub.
        self.glb_proj = jax.random.normal(k1, (3, enc_dim), jnp.float32) * 0.1
        self.loc_proj = jax.random.normal(k2, (3, enc_dim), jnp.float32) * 0.1
        # nn.Conv2d(2*enc_dim, enc_dim, kernel_size=1): weight (enc, 2*enc, 1, 1), bias (enc,)
        fan_in = 2 * enc_dim
        bound = 1.0 / np.sqrt(fan_in)
        self.conv_w = jax.random.uniform(k3, (enc_dim, 2 * enc_dim), jnp.float32, -bound, bound)
        self.conv_b = jax.random.uniform(k4, (enc_dim,), jnp.float32, -bound, bound)

        # hoisted out of forward(): split/transposed conv halves in bf16 (cat order is
        # [resized_glb, loc]), bias as a (1, Cout) f32 row, resize-matrix cache.
        # NOTE: bf16 weights/activations diverge ~1e-2 relative from an f32 PyTorch module.
        self.w_g = jnp.transpose(self.conv_w[:, :enc_dim]).astype(jnp.bfloat16)   # (C, Cout)
        self.w_l = jnp.transpose(self.conv_w[:, enc_dim:]).astype(jnp.bfloat16)   # (C, Cout)
        self.bias2d = self.conv_b.reshape(1, enc_dim)                              # f32
        self._R_cache = {}

    def _resize_matrix(self, ch, cw, lh, lw):
        key = (ch, cw, lh, lw)
        if key not in self._R_cache:
            self._R_cache[key] = jnp.asarray(
                np.kron(bilinear_matrix(ch, lh), bilinear_matrix(cw, lw)))
        return self._R_cache[key]

    def _backbone(self, x_nchw, proj):
        # x_nchw: (N, 3, H, W) -> channels-last bf16 (N, H/s, W/s, enc_dim); emitting NHWC
        # here avoids a full HBM transpose of the big activations right before the kernel.
        n, c, h, w = x_nchw.shape
        s = self.stride
        pooled = x_nchw.reshape(n, c, h // s, s, w // s, s).mean(axis=(3, 5))
        feats = jnp.einsum('nchw,ce->nhwe', pooled, proj)
        return jax.nn.relu(feats).astype(jnp.bfloat16)

    def forward(self, images, csys, ratios, impl="pallas"):
        # images: (B, img_len, 3, H, W)  (NCHW per frame, mirrors the PyTorch input)
        # csys  : numpy (B, patch_num, 2) fractional (top, left) per local patch
        # ratios: numpy (B, 2) fractional (h, w) crop size (equal across batch, as torch.stack requires)
        B, img_len = images.shape[0], images.shape[1]
        patch_num = img_len - 1

        glb_imgs = images[:, :1].reshape((-1,) + images.shape[2:])   # (B, 3, H, W)
        loc_imgs = images[:, 1:].reshape((-1,) + images.shape[2:])   # (B*p, 3, H, W)

        glb_vis = self._backbone(glb_imgs, self.glb_proj)            # (B, gH, gW, enc) bf16
        loc_vis = self._backbone(loc_imgs, self.loc_proj)            # (B*p, lH, lW, enc) bf16
        gH, gW, hid = glb_vis.shape[1], glb_vis.shape[2], glb_vis.shape[3]
        lH, lW = loc_vis.shape[1], loc_vis.shape[2]

        # ---- crop_patches_from_glb: host-side index arithmetic, same as the torch loops
        ratios_np = np.asarray(ratios)
        assert np.allclose(ratios_np, ratios_np[0:1]), \
            "per-batch crop ratios must match (torch.stack in the original requires it)"
        ch = int(np.round(gH * float(ratios_np[0][0])))
        cw = int(np.round(gW * float(ratios_np[0][1])))
        crops = []
        for i in range(B):
            for j in range(patch_num):
                top = int(np.round(float(csys[i][j][0]) * gH))
                left = int(np.round(float(csys[i][j][1]) * gW))
                top = max(0, min(top, gH - ch))      # clamp so every crop is exactly (ch, cw)
                left = max(0, min(left, gW - cw))
                crops.append(glb_vis[i, top:top + ch, left:left + cw, :])
        crops = jnp.stack(crops, axis=0)                             # (N, ch, cw, enc) bf16

        # ---- pixel-major channels-last slabs (no transposes needed: backbone is NHWC)
        N = B * patch_num
        crops_pm = crops.reshape(N, ch * cw, hid)
        loc_pm = loc_vis.reshape(N, lH * lW, hid)

        R = self._resize_matrix(ch, cw, lH, lW)                      # cached f32 (LHW, CHW)

        if impl == "pallas":
            out_pm = g2l_fusion_pallas(R, crops_pm, loc_pm, self.w_g, self.w_l, self.bias2d)
        else:
            out_pm = g2l_fusion_reference(R, crops_pm, loc_pm, self.w_g, self.w_l, self.bias2d)

        # back to PyTorch NCHW output layout: (B*patch_num, enc_dim, lH, lW)
        # (pallas path stays bf16 to halve the HBM writeback; reference stays f32)
        out = jnp.transpose(out_pm.reshape(N, lH, lW, self.enc_dim), (0, 3, 1, 2))
        return out


# -------------------------------------------------------------------------
if __name__ == "__main__":
    key = jax.random.PRNGKey(0)
    k_img, k_model = jax.random.split(key)

    B, patch_num, H, W = 2, 3, 32, 32
    images = jax.random.normal(k_img, (B, patch_num + 1, 3, H, W), jnp.float32)
    csys = np.array([[[0.00, 0.00], [0.25, 0.50], [0.50, 0.25]],
                     [[0.50, 0.50], [0.00, 0.50], [0.25, 0.25]]], dtype=np.float32)
    ratios = np.array([[0.5, 0.5], [0.5, 0.5]], dtype=np.float32)

    model = CoG2LNetPallas(k_model)

    out = model.forward(images, csys, ratios, impl="pallas")
    out = jax.block_until_ready(out)

    ref = model.forward(images, csys, ratios, impl="reference")
    ref = jax.block_until_ready(ref)

    assert out.shape == (B * patch_num, ENC_DIM, H // 4, W // 4), out.shape
    out_f32 = np.asarray(out.astype(jnp.float32))
    ref_f32 = np.asarray(ref.astype(jnp.float32))
    max_err = float(np.max(np.abs(out_f32 - ref_f32)))
    # tolerance loosened vs v2: the kernel emits bf16 and runs the upsample in bf16
    assert np.allclose(out_f32, ref_f32, rtol=5e-2, atol=5e-3), max_err

    print("KERNEL_OK")
</pallas_src>

<mosaic_0001>
module attributes {stable_mosaic.version = 11 : i64} {
  func.func @g2l_fusion_kernel(%arg0: i32, %arg1: i32, %arg2: memref<64x16xbf16, #tpu.memory_space<vmem>>, %arg3: memref<3x16x128xbf16, #tpu.memory_space<vmem>>, %arg4: memref<3x64x128xbf16, #tpu.memory_space<vmem>>, %arg5: memref<128x128xbf16, #tpu.memory_space<vmem>>, %arg6: memref<128x128xbf16, #tpu.memory_space<vmem>>, %arg7: memref<1x128xf32, #tpu.memory_space<vmem>>, %arg8: memref<3x64x128xbf16, #tpu.memory_space<vmem>>) attributes {dimension_semantics = [#tpu.dimension_semantics<parallel>, #tpu.dimension_semantics<parallel>], iteration_bounds = array<i64: 2, 1>, scalar_prefetch = 0 : i64, scratch_operands = 0 : i64, tpu.core_type = #tpu.core_type<tc>, window_params = [{pipeline_mode = #tpu.pipeline_mode<synchronous>, transform_indices = @transform_0, window_bounds = array<i64: 64, 16>}, {transform_indices = @transform_1, window_bounds = array<i64: 3, 16, 128>}, {transform_indices = @transform_2, window_bounds = array<i64: 3, 64, 128>}, {transform_indices = @transform_3, window_bounds = array<i64: 128, 128>}, {transform_indices = @transform_4, window_bounds = array<i64: 128, 128>}, {transform_indices = @transform_5, window_bounds = array<i64: 1, 128>}, {transform_indices = @transform_6, window_bounds = array<i64: 3, 64, 128>}]} {
    %c0 = arith.constant 0 : index
    %c0_0 = arith.constant 0 : index
    %c0_1 = arith.constant 0 : index
    %0 = vector.load %arg4[%c0, %c0_0, %c0_1] : memref<3x64x128xbf16, #tpu.memory_space<vmem>>, vector<3x64x128xbf16>
    %1 = vector.shape_cast %0 : vector<3x64x128xbf16> to vector<192x128xbf16>
    %c0_2 = arith.constant 0 : index
    %c0_3 = arith.constant 0 : index
    %2 = vector.load %arg6[%c0_2, %c0_3] : memref<128x128xbf16, #tpu.memory_space<vmem>>, vector<128x128xbf16>
    %cst = arith.constant dense<0.000000e+00> : vector<192x128xf32>
    %3 = tpu.matmul %1, %2, %cst {dimension_numbers = #tpu.dot_dimension_numbers<[1], [0], [0], [1], [0, 0, 1, 1], [], []>} : vector<192x128xbf16>, vector<128x128xbf16>, vector<192x128xf32> -> vector<192x128xf32>
    %c0_4 = arith.constant 0 : index
    %c0_5 = arith.constant 0 : index
    %4 = vector.load %arg7[%c0_4, %c0_5] : memref<1x128xf32, #tpu.memory_space<vmem>>, vector<1x128xf32>
    %5 = vector.broadcast %4 : vector<1x128xf32> to vector<192x128xf32>
    %6 = arith.addf %3, %5 : vector<192x128xf32>
    %7 = vector.shape_cast %6 : vector<192x128xf32> to vector<3x64x128xf32>
    %8 = arith.truncf %7 : vector<3x64x128xf32> to vector<3x64x128xbf16>
    %c0_6 = arith.constant 0 : index
    %c0_7 = arith.constant 0 : index
    %c0_8 = arith.constant 0 : index
    %9 = vector.load %arg8[%c0_6, %c0_7, %c0_8] : memref<3x64x128xbf16, #tpu.memory_space<vmem>>, vector<3x64x128xbf16>
    tpu.vector_store %arg8[%c0_6, %c0_7, %c0_8], %8 {strides = array<i32>} : memref<3x64x128xbf16, #tpu.memory_space<vmem>>, vector<3x64x128xbf16>,
    %c0_9 = arith.constant 0 : index
    %c0_10 = arith.constant 0 : index
    %c0_11 = arith.constant 0 : index
    %10 = vector.load %arg3[%c0_9, %c0_10, %c0_11] : memref<3x16x128xbf16, #tpu.memory_space<vmem>>, vector<3x16x128xbf16>
    %11 = vector.shape_cast %10 : vector<3x16x128xbf16> to vector<48x128xbf16>
    %c0_12 = arith.constant 0 : index
    %c0_13 = arith.constant 0 : index
    %12 = vector.load %arg5[%c0_12, %c0_13] : memref<128x128xbf16, #tpu.memory_space<vmem>>, vector<128x128xbf16>
    %cst_14 = arith.constant dense<0.000000e+00> : vector<48x128xf32>
    %13 = tpu.matmul %11, %12, %cst_14 {dimension_numbers = #tpu.dot_dimension_numbers<[1], [0], [0], [1], [0, 0, 1, 1], [], []>} : vector<48x128xbf16>, vector<128x128xbf16>, vector<48x128xf32> -> vector<48x128xf32>
    %14 = arith.truncf %13 : vector<48x128xf32> to vector<48x128xbf16>
    %15 = vector.shape_cast %14 : vector<48x128xbf16> to vector<3x16x128xbf16>
    %c0_15 = arith.constant 0 : index
    %c0_16 = arith.constant 0 : index
    %16 = vector.load %arg2[%c0_15, %c0_16] : memref<64x16xbf16, #tpu.memory_space<vmem>>, vector<64x16xbf16>
    %17 = vector.extract_strided_slice %15 {offsets = [0, 0, 0], sizes = [1, 16, 128], strides = [1, 1, 1]} : vector<3x16x128xbf16> to vector<1x16x128xbf16>
    %18 = vector.shape_cast %17 : vector<1x16x128xbf16> to vector<16x128xbf16>
    %cst_17 = arith.constant dense<0.000000e+00> : vector<64x128xf32>
    %19 = tpu.matmul %16, %18, %cst_17 {dimension_numbers = #tpu.dot_dimension_numbers<[1], [0], [0], [1], [0, 0, 1, 1], [], []>} : vector<64x16xbf16>, vector<16x128xbf16>, vector<64x128xf32> -> vector<64x128xf32>
    %c0_18 = arith.constant 0 : index
    %c0_19 = arith.constant 0 : index
    %c0_20 = arith.constant 0 : index
    %20 = vector.load %arg8[%c0_18, %c0_19, %c0_20] : memref<3x64x128xbf16, #tpu.memory_space<vmem>>, vector<1x64x128xbf16>
    %21 = vector.shape_cast %20 : vector<1x64x128xbf16> to vector<64x128xbf16>
    %22 = arith.extf %21 : vector<64x128xbf16> to vector<64x128xf32>
    %23 = arith.addf %22, %19 : vector<64x128xf32>
    %24 = arith.truncf %23 : vector<64x128xf32> to vector<64x128xbf16>
    %c0_21 = arith.constant 0 : index
    %c0_22 = arith.constant 0 : index
    %c0_23 = arith.constant 0 : index
    %25 = vector.load %arg8[%c0_21, %c0_22, %c0_23] : memref<3x64x128xbf16, #tpu.memory_space<vmem>>, vector<1x64x128xbf16>
    %26 = vector.shape_cast %25 : vector<1x64x128xbf16> to vector<64x128xbf16>
    %27 = vector.shape_cast %24 : vector<64x128xbf16> to vector<1x64x128xbf16>
    tpu.vector_store %arg8[%c0_21, %c0_22, %c0_23], %27 {strides = array<i32>} : memref<3x64x128xbf16, #tpu.memory_space<vmem>>, vector<1x64x128xbf16>,
    %28 = vector.extract_strided_slice %15 {offsets = [1, 0, 0], sizes = [1, 16, 128], strides = [1, 1, 1]} : vector<3x16x128xbf16> to vector<1x16x128xbf16>
    %29 = vector.shape_cast %28 : vector<1x16x128xbf16> to vector<16x128xbf16>
    %cst_24 = arith.constant dense<0.000000e+00> : vector<64x128xf32>
    %30 = tpu.matmul %16, %29, %cst_24 {dimension_numbers = #tpu.dot_dimension_numbers<[1], [0], [0], [1], [0, 0, 1, 1], [], []>} : vector<64x16xbf16>, vector<16x128xbf16>, vector<64x128xf32> -> vector<64x128xf32>
    %c1 = arith.constant 1 : index
    %c0_25 = arith.constant 0 : index
    %c0_26 = arith.constant 0 : index
    %31 = vector.load %arg8[%c1, %c0_25, %c0_26] : memref<3x64x128xbf16, #tpu.memory_space<vmem>>, vector<1x64x128xbf16>
    %32 = vector.shape_cast %31 : vector<1x64x128xbf16> to vector<64x128xbf16>
    %33 = arith.extf %32 : vector<64x128xbf16> to vector<64x128xf32>
    %34 = arith.addf %33, %30 : vector<64x128xf32>
    %35 = arith.truncf %34 : vector<64x128xf32> to vector<64x128xbf16>
    %c1_27 = arith.constant 1 : index
    %c0_28 = arith.constant 0 : index
    %c0_29 = arith.constant 0 : index
    %36 = vector.load %arg8[%c1_27, %c0_28, %c0_29] : memref<3x64x128xbf16, #tpu.memory_space<vmem>>, vector<1x64x128xbf16>
    %37 = vector.shape_cast %36 : vector<1x64x128xbf16> to vector<64x128xbf16>
    %38 = vector.shape_cast %35 : vector<64x128xbf16> to vector<1x64x128xbf16>
    tpu.vector_store %arg8[%c1_27, %c0_28, %c0_29], %38 {strides = array<i32>} : memref<3x64x128xbf16, #tpu.memory_space<vmem>>, vector<1x64x128xbf16>,
    %39 = vector.extract_strided_slice %15 {offsets = [2, 0, 0], sizes = [1, 16, 128], strides = [1, 1, 1]} : vector<3x16x128xbf16> to vector<1x16x128xbf16>
    %40 = vector.shape_cast %39 : vector<1x16x128xbf16> to vector<16x128xbf16>
    %cst_30 = arith.constant dense<0.000000e+00> : vector<64x128xf32>
    %41 = tpu.matmul %16, %40, %cst_30 {dimension_numbers = #tpu.dot_dimension_numbers<[1], [0], [0], [1], [0, 0, 1, 1], [], []>} : vector<64x16xbf16>, vector<16x128xbf16>, vector<64x128xf32> -> vector<64x128xf32>
    %c2 = arith.constant 2 : index
    %c0_31 = arith.constant 0 : index
    %c0_32 = arith.constant 0 : index
    %42 = vector.load %arg8[%c2, %c0_31, %c0_32] : memref<3x64x128xbf16, #tpu.memory_space<vmem>>, vector<1x64x128xbf16>
    %43 = vector.shape_cast %42 : vector<1x64x128xbf16> to vector<64x128xbf16>
    %44 = arith.extf %43 : vector<64x128xbf16> to vector<64x128xf32>
    %45 = arith.addf %44, %41 : vector<64x128xf32>
    %46 = arith.truncf %45 : vector<64x128xf32> to vector<64x128xbf16>
    %c2_33 = arith.constant 2 : index
    %c0_34 = arith.constant 0 : index
    %c0_35 = arith.constant 0 : index
    %47 = vector.load %arg8[%c2_33, %c0_34, %c0_35] : memref<3x64x128xbf16, #tpu.memory_space<vmem>>, vector<1x64x128xbf16>
    %48 = vector.shape_cast %47 : vector<1x64x128xbf16> to vector<64x128xbf16>
    %49 = vector.shape_cast %46 : vector<64x128xbf16> to vector<1x64x128xbf16>
    tpu.vector_store %arg8[%c2_33, %c0_34, %c0_35], %49 {strides = array<i32>} : memref<3x64x128xbf16, #tpu.memory_space<vmem>>, vector<1x64x128xbf16>,
    return
  }
  func.func @transform_0(%arg0: i32, %arg1: i32) -> (i32, i32) {
    %c0_i32 = arith.constant 0 : i32
    %c0_i32_0 = arith.constant 0 : i32
    %c0_i32_1 = arith.constant 0 : i32
    return %c0_i32, %c0_i32_0 : i32, i32
  }
  func.func @transform_1(%arg0: i32, %arg1: i32) -> (i32, i32, i32) {
    %c0_i32 = arith.constant 0 : i32
    %c0_i32_0 = arith.constant 0 : i32
    %c0_i32_1 = arith.constant 0 : i32
    return %arg0, %c0_i32, %c0_i32_0 : i32, i32, i32
  }
  func.func @transform_2(%arg0: i32, %arg1: i32) -> (i32, i32, i32) {
    %c0_i32 = arith.constant 0 : i32
    %c0_i32_0 = arith.constant 0 : i32
    %c0_i32_1 = arith.constant 0 : i32
    return %arg0, %c0_i32, %c0_i32_0 : i32, i32, i32
  }
  func.func @transform_3(%arg0: i32, %arg1: i32) -> (i32, i32) {
    %c0_i32 = arith.constant 0 : i32
    %c0_i32_0 = arith.constant 0 : i32
    return %c0_i32, %arg1 : i32, i32
  }
  func.func @transform_4(%arg0: i32, %arg1: i32) -> (i32, i32) {
    %c0_i32 = arith.constant 0 : i32
    %c0_i32_0 = arith.constant 0 : i32
    return %c0_i32, %arg1 : i32, i32
  }
  func.func @transform_5(%arg0: i32, %arg1: i32) -> (i32, i32) {
    %c0_i32 = arith.constant 0 : i32
    %c0_i32_0 = arith.constant 0 : i32
    return %c0_i32, %arg1 : i32, i32
  }
  func.func @transform_6(%arg0: i32, %arg1: i32) -> (i32, i32, i32) {
    %c0_i32 = arith.constant 0 : i32
    %c0_i32_0 = arith.constant 0 : i32
    return %arg0, %c0_i32, %arg1 : i32, i32, i32
  }
}

</mosaic_0001>

<bundles_post_ra>
// kernel: tpu_custom_call.1
= control target key start
LH: loop header
LB: loop body
LE: loop exit
PB: predicated region body
PF: predicated region fallthrough
CT: control target
= control target key end

     0   :  { %s2899_s0 = inlined_call_operand.vmem [shape: bf16[64,16], index: 0, kind: input, shape index: {}]   ;;  %s2900_s1 = inlined_call_operand.hbm [shape: bf16[6,16,128], index: 1, kind: input, shape index: {}]   ;;  %s2901_s2 = inlined_call_operand.hbm [shape: bf16[6,64,128], index: 2, kind: input, shape index: {}]   ;;  %s2902_s3 = inlined_call_operand.hbm [shape: bf16[128,128], index: 3, kind: input, shape index: {}]   ;;  %s2903_s4 = inlined_call_operand.hbm [shape: bf16[128,128], index: 4, kind: input, shape index: {}]   ;;  %s2904_s5 = inlined_call_operand.vmem [shape: f32[1,128], index: 5, kind: input, shape index: {}]   ;;  %s2905_s6 = inlined_call_operand.hbm [shape: bf16[6,64,128], index: 6, kind: output, shape index: {}]  }
   0x1   :  { %2915 = sst [smem:[#allocation19_spill]] %s2900_s1 }
   0x2   :  { %2916 = sst [smem:[#allocation20_spill]] %s2902_s3 }
   0x3   :  { %2917 = sst [smem:[#allocation21_spill]] %s2903_s4 }
   0x4   :  { %11 = vsyncpa [#allocation3], 0 }
   0x5   :  { %13 = vsyncpa [#allocation3 + $0x1], 0 }
   0x6   :  { %14 = vsyncpa [#allocation6], 0 }
   0x7   :  { %16 = vsyncpa [#allocation6 + $0x1], 0 }
   0x8   :  { %17 = vsyncpa [#allocation9], 0 }
   0x9   :  { %18 = vsyncpa [#allocation4], 0 }
   0xa   :  { %20 = vsyncpa [#allocation4 + $0x1], 0  ;;  %s2477_s21 = smov 0   ;;  %s2479_s22 = smov 0  }
   0xb   :  { %s2481_s23 = smov 0   ;;  %s2483_s24 = smov 0  }
   0xc   :  { %s2485_s25 = smov 0   ;;  %s2487_s26 = smov 0  }
   0xd LB: > { %2918 = sst [smem:[#allocation16_spill]] %s2417_s23  ;;  %s2508_s27 = sadd.s32 4294967295, %s2429_s26   ;;  %s2429_s26 = sphi %s2487_s26, %s26_s26   ;;  %s2425_s25 = sphi %s2485_s25, %s2947_s25   ;;  %s2421_s24 = sphi %s2483_s24, %s2946_s24   ;;  %s2417_s23 = sphi %s2481_s23, %s2942_s23   ;;  %s2413_s22 = sphi %s2479_s22, %s2945_s22   ;;  %s2409_s21 = sphi %s2477_s21, %s2944_s21  }
   0xe   : > { %s1539_s28 = sadd.s32 4294967294, %s2429_s26   ;;  %p79_p0 = scmp.ne.s32.totalorder %s2413_s22, %s2409_s21 }
   0xf   : > { %p2906_p1 = scmp.eq.s32.totalorder %s2508_s27, 0  ;;  %p215_p3 = scmp.eq.s32.totalorder %s1539_s28, 1 }
  0x10   : > { %p1540_p5 = scmp.ge.s32.totalorder %s2429_s26, 1  ;;  %p222_p7 = scmp.lt.s32.totalorder %s2429_s26, 3 }
  0x11   : > { %p2517_p4 = por %p2906_p1, %p79_p0  ;;  %p2522_p6 = por %p215_p3, %p79_p0 }
  0x12   : > { %p2527_p8 = pnand %p1540_p5, %p222_p7  ;;  %s2431_s8 = smov [#allocation7]  }
  0x13   : > { %s2919_s29 = scalar_select %p2517_p4, 1, 0 }
  0x14   : > { %s2920_s30 = scalar_select %p2522_p6, 1, 0 }
  0x15   : > { %s239_s9 = sshll.u32 %s2431_s8, 4  ;;  %p2104_p9 = pneg %p2527_p8  ;;  %s2531_s9 = int_to_ptr.vmem [resolvable:$true] %s239_s9 }
  0x16   : > { %s2432_s11 = smov [#allocation8]   ;;  %s2923_s3 = sld [smem:[#allocation20_spill]] }
  0x17   : > { %p2538_p11 = pnand %p2104_p9, %p2906_p1  ;;  %s254_s12 = sshll.u32 %s2432_s11, 4  ;;  %s2542_s12 = int_to_ptr.vmem [resolvable:$true] %s254_s12 }
  0x19   : > { %p2221_p13 = pneg %p2538_p11 }
  0x1c   : > { %s2219_s15 = scalar_lea.hbm %s2923_s3, 1024 }
  0x1d   : > { %p2220_p12 = scmp.ne.s32.totalorder %s2923_s3, %s2219_s15  ;;  %p2226_p5 = scmp.lt.u32.totalorder %s2219_s15, %s2923_s3 }
  0x1f   : > { %p2222_p0 = pnand %p2221_p13, %p2220_p12 }
  0x21   : > { %p2223_p3 = pneg %p2222_p0 }
  0x23   : > { %p2228_p7 = pnand %p2226_p5, %p2223_p3 }
  0x25   : > { %2231 = shalt.err (!%p2228_p7)
}
  0x26   : > { %s2232_s20 = scalar_lea.vmem %s2531_s9, 1024  ;;  %p2240_p2 = scmp.lt.s32.totalorder %s2531_s9, %s2531_s9 }
  0x27   : > { %p2233_p9 = scmp.ne.s32.totalorder %s2531_s9, %s2232_s20  ;;  %p2241_p12 = scmp.lt.s32.totalorder %s2232_s20, %s2232_s20 }
  0x29   : > { %p2235_p10 = pnand %p2233_p9, %p2221_p13  ;;  %p2242_p0 = por %p2241_p12, %p2240_p2 }
  0x2b   : > { %p2236_p1 = pneg %p2235_p10 }
  0x2d   : > { %p2243_p6 = pnand %p2242_p0, %p2236_p1 }
  0x2f   : > { %2246 = shalt.err (!%p2243_p6)
}
  0x30   : > { %s2907_s28 = smov 64   ;;  %s2909_s8 = smov 4  }
  0x31   : > { %2107 = dma.hbm_to_vmem [thread:$0]  (!%p2538_p11), %s2923_s3, 1024, %s2531_s9, [#allocation6], %s2907_s28, %s2907_s28, %s2909_s8  }
  0x32   : > { %s2924_s4 = sld [smem:[#allocation21_spill]] }
  0x38   : > { %s2247_s16 = scalar_lea.hbm %s2924_s4, 1024 }
  0x39   : > { %p2248_p1 = scmp.ne.s32.totalorder %s2924_s4, %s2247_s16  ;;  %p2254_p10 = scmp.lt.u32.totalorder %s2247_s16, %s2924_s4 }
  0x3b   : > { %p2250_p2 = pnand %p2248_p1, %p2221_p13 }
  0x3d   : > { %p2251_p6 = pneg %p2250_p2 }
  0x3f   : > { %p2256_p3 = pnand %p2254_p10, %p2251_p6 }
  0x41   : > { %2259 = shalt.err (!%p2256_p3)
}
  0x42   : > { %s2260_s9 = scalar_lea.vmem %s2542_s12, 1024  ;;  %p2268_p12 = scmp.lt.s32.totalorder %s2542_s12, %s2542_s12 }
  0x43   : > { %p2261_p5 = scmp.ne.s32.totalorder %s2542_s12, %s2260_s9  ;;  %p2269_p0 = scmp.lt.s32.totalorder %s2260_s9, %s2260_s9 }
  0x45   : > { %p2263_p7 = pnand %p2261_p5, %p2221_p13  ;;  %p2270_p1 = por %p2269_p0, %p2268_p12 }
  0x47   : > { %p2264_p9 = pneg %p2263_p7 }
  0x49   : > { %p2271_p2 = pnand %p2270_p1, %p2264_p9 }
  0x4b   : > { %2274 = shalt.err (!%p2271_p2)
}
  0x4c   : > { %2110 = dma.hbm_to_vmem [thread:$0]  (!%p2538_p11), %s2924_s4, 1024, %s2542_s12, [#allocation9], %s2907_s28, %s2907_s28, %s2909_s8  }
  0x4d   : > { %s38_s10 = sadd.s32 1, %s2425_s25  ;;  %s66_s14 = sadd.s32 1, %s2417_s23 }
  0x4e   : > { %p40_p13 = scmp.ge.s32.totalorder %s38_s10, 2  ;;  %p73_p6 = scmp.ne.s32.totalorder %s2417_s23, %s2413_s22 }
  0x4f   : > { %p74_p10 = scmp.eq.s32.totalorder %s2429_s26, 0  ;;  %p2124_p3 = scmp.lt.s32.totalorder %s2429_s26, 2 }
  0x50   : > { %s2949_s10 = smov (%p40_p13, %s38_s10), 0  ;;  %p2926_p7 = scmp.eq.s32.totalorder %s2508_s27, 1 }
  0x51   : > { %2925 = sst [smem:[#allocation17_spill]] %s2949_s10  ;;  %p75_p5 = por %p74_p10, %p73_p6 }
  0x52   : > { %p2612_p9 = por %p2926_p7, %p73_p6  ;;  %s63_s16 = ssub.s32 %s2425_s25, %s2949_s10 }
  0x53   : > { %s2619_s17 = sand.u32 1, %s2417_s23   ;;  %p64_p11 = scmp.eq.s32.totalorder %s63_s16, 0 }
  0x54   : > { %s2927_s15 = scalar_select %p2612_p9, 1, 0 }
  0x55   : > { %s2086_s12 = smul.u32 24, %s2619_s17  ;;  %p2622_p12 = pnand %p2124_p3, %p75_p5 }
  0x56   : > { %s2627_s19 = scalar_select %p64_p11, %s2417_s23, %s66_s14  }
  0x57   : > { %s1906_s20 = smul.u32 384, %s2425_s25  ;;  %s278_s9 = scalar_lea.vmem [#allocation2], %s2086_s12 }
  0x58   : > { %2929 = sst [smem:[#allocation18_spill]] %s2627_s19  ;;  %s286_s11 = sshll.u32 %s278_s9, 4  ;;  %s2635_s11 = int_to_ptr.vmem [resolvable:$true] %s286_s11 }
  0x59   : > { %s2930_s1 = sld [smem:[#allocation19_spill]]  ;;  %s275_s16 = scalar_lea.sflag [#allocation3], %s2619_s17 }
  0x5a   : > { %p2277_p1 = pneg %p2622_p12 }
  0x5f   : > { %s2633_s8 = scalar_lea.hbm %s2930_s1, %s1906_s20  ;;  %s2280_s28 = scalar_lea.hbm %s2930_s1, 768 }
  0x60   : > { %s2275_s3 = scalar_lea.hbm %s2633_s8, 384  ;;  %p2281_p6 = scmp.lt.u32.totalorder %s2633_s8, %s2930_s1 }
  0x61   : > { %p2276_p0 = scmp.ne.s32.totalorder %s2633_s8, %s2275_s3  ;;  %p2282_p10 = scmp.lt.u32.totalorder %s2280_s28, %s2275_s3 }
  0x62   : > { %p2284_p5 = scmp.lt.u32.totalorder %s2275_s3, %s2633_s8 }
  0x63   : > { %p2278_p2 = pnand %p2277_p1, %p2276_p0  ;;  %p2283_p3 = por %p2282_p10, %p2281_p6 }
  0x65   : > { %p2279_p13 = pneg %p2278_p2  ;;  %p2285_p7 = por %p2284_p5, %p2283_p3 }
  0x67   : > { %p2286_p11 = pnand %p2285_p7, %p2279_p13 }
  0x69   : > { %2289 = shalt.err (!%p2286_p11)
}
  0x6a   : > { %s2290_s13 = scalar_lea.vmem %s2635_s11, 384  ;;  %s2435_s14 = smov [#allocation2]  }
  0x6b   : > { %p2291_p0 = scmp.ne.s32.totalorder %s2635_s11, %s2290_s13  ;;  %s2295_s12 = sshll.u32 %s2435_s14, 4  ;;  %s2296_s12 = int_to_ptr.vmem [resolvable:$false] %s2295_s12 }
  0x6c   : > { %s2297_s20 = scalar_lea.vmem %s2296_s12, 768  ;;  %p2298_p4 = scmp.lt.s32.totalorder %s2635_s11, %s2296_s12 }
  0x6d   : > { %p2293_p2 = pnand %p2291_p0, %p2277_p1  ;;  %p2299_p6 = scmp.lt.s32.totalorder %s2297_s20, %s2290_s13 }
  0x6f   : > { %p2294_p9 = pneg %p2293_p2  ;;  %p2300_p10 = por %p2299_p6, %p2298_p4 }
  0x71   : > { %p2301_p3 = pnand %p2300_p10, %p2294_p9 }
  0x73   : > { %2304 = shalt.err (!%p2301_p3)
}
  0x74   : > { %s2931_s3 = smov 4   ;;  %s2932_s28 = smov 64  }
  0x75   : > { %2114 = dma.hbm_to_vmem [thread:$0]  (!%p2622_p12), %s2633_s8, 384, %s2635_s11, %s275_s16, %s2932_s28, %s2932_s28, %s2931_s3  }
  0x76   : > { %s296_s9 = sand.u32 1, %s2429_s26   ;;  %s2087_s14 = smul.u32 96, %s2619_s17 }
  0x77   : > { %s1907_s13 = smul.u32 1536, %s2425_s25  ;;  %s2678_s19 = scalar_lea.sflag [#allocation6], %s296_s9 }
  0x78   : > { %s300_s4 = scalar_lea.vmem [#allocation5], %s2087_s14  ;;  %s2310_s11 = scalar_lea.hbm %s2901_s2, 3072 }
  0x79   : > { %s2674_s1 = scalar_lea.hbm %s2901_s2, %s1907_s13  ;;  %s308_s10 = sshll.u32 %s300_s4, 4  ;;  %s2676_s10 = int_to_ptr.vmem [resolvable:$true] %s308_s10 }
  0x7a   : > { %s2305_s23 = scalar_lea.hbm %s2674_s1, 1536  ;;  %p2311_p5 = scmp.lt.u32.totalorder %s2674_s1, %s2901_s2 }
  0x7b   : > { %p2306_p4 = scmp.ne.s32.totalorder %s2674_s1, %s2305_s23  ;;  %p2312_p7 = scmp.lt.u32.totalorder %s2310_s11, %s2305_s23 }
  0x7c   : > { %p2314_p0 = scmp.lt.u32.totalorder %s2305_s23, %s2674_s1 }
  0x7d   : > { %p2308_p9 = pnand %p2306_p4, %p2277_p1  ;;  %p2313_p11 = por %p2312_p7, %p2311_p5 }
  0x7f   : > { %p2309_p13 = pneg %p2308_p9  ;;  %p2315_p2 = por %p2314_p0, %p2313_p11 }
  0x81   : > { %p2316_p6 = pnand %p2315_p2, %p2309_p13 }
  0x83   : > { %2319 = shalt.err (!%p2316_p6)
}
  0x84   : > { %s2320_s4 = scalar_lea.vmem %s2676_s10, 1536  ;;  %s2436_s9 = smov [#allocation5]  }
  0x85   : > { %p2321_p10 = scmp.ne.s32.totalorder %s2676_s10, %s2320_s4  ;;  %s2325_s14 = sshll.u32 %s2436_s9, 4  ;;  %s2326_s14 = int_to_ptr.vmem [resolvable:$false] %s2325_s14 }
  0x86   : > { %s2327_s12 = scalar_lea.vmem %s2326_s14, 3072  ;;  %p2328_p9 = scmp.lt.s32.totalorder %s2676_s10, %s2326_s14 }
  0x87   : > { %p2323_p3 = pnand %p2321_p10, %p2277_p1  ;;  %p2329_p5 = scmp.lt.s32.totalorder %s2327_s12, %s2320_s4 }
  0x89   : > { %p2324_p4 = pneg %p2323_p3  ;;  %p2330_p7 = por %p2329_p5, %p2328_p9 }
  0x8b   : > { %p2331_p11 = pnand %p2330_p7, %p2324_p4 }
  0x8d   : > { %2334 = shalt.err (!%p2331_p11)
}
  0x8e   : > { %2117 = dma.hbm_to_vmem [thread:$0]  (!%p2622_p12), %s2674_s1, 1536, %s2676_s10, %s2678_s19, %s2932_s28, %s2932_s28, %s2931_s3  }
  0x8f   : > { %320 = sbr.rel (%p2527_p8) target bundleno = 672 (0x2a0), region = 44  ;;  %s2710_s23 = sand.u32 (!%p2527_p8), 1, %s2413_s22  }
  0x90   : > { %s2088_s20 = smul.u32 (!%p2527_p8), 24, %s2710_s23  ;;  %s323_s8 = scalar_lea.sflag (!%p2527_p8), [#allocation3], %s2710_s23 }
  0x91   : > { %p2933_p1 = scmp.ne.s32.totalorder (!%p2527_p8), %s2919_s29, 0 }
  0x92   : > { %s2714_s17 = scalar_lea.vmem (!%p2527_p8), [#allocation2], %s2088_s20 }
  0x96   : > { %2388 = dma.done.wait (%p2933_p1), %s323_s8, 384  }
  0x97   : > { %2390 = vsyncadd (%p2933_p1), %s323_s8, 4294966912  ;;  %s331_s1 = sand.u32 1, %s2508_s27   ;;  %s2089_s7 = smul.u32 96, %s2710_s23 }
  0x98   : > { %s332_s10 = scalar_lea.sflag [#allocation6], %s331_s1 }
  0x99   : > { %s2724_s18 = scalar_lea.vmem [#allocation5], %s2089_s7 }
  0x9a   : > { %2392 = dma.done.wait (%p2933_p1), %s332_s10, 1536  }
  0x9b   : > { %2394 = vsyncadd (%p2933_p1), %s332_s10, 4294965760  ;;  %p2934_p8 = scmp.eq.s32.totalorder %s2508_s27, 0 }
  0x9d   : > { %2396 = dma.done.wait (%p2934_p8), [#allocation6], 1024   ;;  %p2935_p12 = pmov %p2934_p8 }
  0x9e   : > { %p2936_p13 = pmov %p2934_p8 }
  0x9f   : > { %2398 = vsyncadd (%p2935_p12), [#allocation6], 4294966272 }
  0xa0   : > { %2400 = dma.done.wait (%p2936_p13), [#allocation9], 1024   ;;  %p2937_p0 = pmov %p2934_p8 }
  0xa1   : > { %v2437_v0 = vmov 0.0   ;;  %vm2438_vm0 = vmmov 0   ;;  %v2184_v1 = vld [vmem:[#allocation7] sm:$0xff]   ;;  %v2185_v2 = vld [vmem:[#allocation7 + $0x8] sm:$0xff]   ;;  %v2186_v3 = vld [vmem:[#allocation7 + $0x10] sm:$0xff]   ;;  %vm979_vm1 = vcmask 130048  }
  0xa2   : > { %2402 = vsyncadd (%p2937_p0), [#allocation9], 4294966272  ;;  %2028 = vmatprep.subr.bf16.mxu1 %v2437_v0  ;;  %2044 = vmatprep.mubr.msk.bf16.mxu1 %vm2438_vm0, %v2437_v0  ;;  %v2187_v4 = vld [vmem:[#allocation7 + $0x18] sm:$0xff]   ;;  %v2195_v5 = vld [vmem:[#allocation8] sm:$0xff]   ;;  %s2809_s14 = scalar_lea.vmem [#allocation10], %s2089_s7  ;;  %s1941_s12 = smul.u32 1536, %s2421_s24 }
  0xa3   : > { %2029 = vmatpush3.bf16.msra.mxu1 %v2184_v1  ;;  %v2196_v6 = vld [vmem:[#allocation8 + $0x8] sm:$0xff]   ;;  %v2188_v7 = vld [vmem:[#allocation7 + $0x20] sm:$0xff]   ;;  %1988 = vmatprep.subr.bf16.mxu0 %v2195_v5  ;;  %v2197_v8 = vld [vmem:[#allocation8 + $0x10] sm:$0xff]   ;;  %s1397_s20 = sshll.u32 %s2809_s14, 4  ;;  %s1382_s1 = scalar_lea.sflag [#allocation4], %s2710_s23  ;;  %s2846_s20 = int_to_ptr.vmem [resolvable:$true] %s1397_s20 }
  0xa4   : > { %2030 = vmatprep.subr.bf16.mxu1 %v2437_v0  ;;  %1989 = vmatpush3.bf16.msra.mxu0 %v2195_v5  ;;  %v2189_v9 = vld [vmem:[#allocation7 + $0x28] sm:$0xff]   ;;  %v2198_v10 = vld [vmem:[#allocation8 + $0x18] sm:$0xff]   ;;  %v2190_v11 = vld [vmem:[#allocation7 + $0x30] sm:$0xff]   ;;  %s2335_s7 = scalar_lea.vmem %s2846_s20, 1536  ;;  %p2938_p6 = scmp.ne.s32.totalorder %s2927_s15, 0 }
  0xa5   : > { %1990 = vmatprep.subr.bf16.mxu0 %v2196_v6  ;;  %v2191_v12 = vld [vmem:[#allocation7 + $0x38] sm:$0xff]   ;;  %v2192_v13 = vld [vmem:[%s2714_s17] sm:$0xff]   ;;  %v2199_v16 = vld [vmem:[#allocation8 + $0x20] sm:$0xff]   ;;  %p2336_p2 = scmp.ne.s32.totalorder %s2846_s20, %s2335_s7  ;;  %s2439_s10 = smov [#allocation10]  }
  0xa6   : > { %v2193_v14 = vld [vmem:[%s2714_s17 + $0x8] sm:$0xff]   ;;  %v2194_v15 = vld [vmem:[%s2714_s17 + $0x10] sm:$0xff]   ;;  %v2200_v17 = vld [vmem:[#allocation8 + $0x28] sm:$0xff]   ;;  %s2844_s17 = scalar_lea.hbm %s2905_s6, %s1941_s12 }
  0xa7   : > { %2031 = vmatpush3.bf16.msra.mxu1 %v2185_v2  ;;  %v2201_v18 = vld [vmem:[#allocation8 + $0x30] sm:$0xff]   ;;  %v2202_v19 = vld [vmem:[#allocation8 + $0x38] sm:$0xff]   ;;  %v2205_v20 = vld [vmem:[%s2724_s18] sm:$0xff]   ;;  %p2337_p10 = pnand %p2336_p2, %p2938_p6 }
  0xa8   : > { %2032 = vmatprep.subr.bf16.mxu1 %v2437_v0  ;;  %1991 = vmatpush3.bf16.msra.mxu0 %v2196_v6  ;;  %v2206_v21 = vld [vmem:[%s2724_s18 + $0x8] sm:$0xff]   ;;  %v2207_v22 = vld [vmem:[%s2724_s18 + $0x10] sm:$0xff]   ;;  %v2208_v23 = vld [vmem:[%s2724_s18 + $0x18] sm:$0xff]  }
  0xa9   : > { %1992 = vmatprep.subr.bf16.mxu0 %v2197_v8  ;;  %2004 = vmatprep.mubr.bf16.mxu0 %v2205_v20  ;;  %v2209_v24 = vld [vmem:[%s2724_s18 + $0x20] sm:$0xff]   ;;  %v2210_v25 = vld [vmem:[%s2724_s18 + $0x28] sm:$0xff]   ;;  %v2211_v26 = vld [vmem:[%s2724_s18 + $0x30] sm:$0xff]   ;;  %p2338_p3 = pneg %p2337_p10 }
  0xaa   : > { %v2213_v27 = vld [vmem:[%s2724_s18 + $0x38] sm:$0xff]   ;;  %v2215_v28 = vld [vmem:[%s2724_s18 + $0x40] sm:$0xff]   ;;  %v2216_v29 = vld [vmem:[%s2724_s18 + $0x48] sm:$0xff]  }
  0xab   : > { %2033 = vmatpush3.bf16.msra.mxu1 %v2186_v3  ;;  %v2203_v30 = vld [vmem:[%s2899_s0] sm:$0xff]   ;;  %v2218_v32 = vld [vmem:[%s2724_s18 + $0x58] sm:$0xff]   ;;  %v2212_v39 = vld [vmem:[%s2899_s0 + $0x10] sm:$0xff]  }
  0xac   : > { %2034 = vmatprep.subr.bf16.mxu1 %v2437_v0  ;;  %1993 = vmatpush3.bf16.msra.mxu0 %v2197_v8  ;;  %v2217_v31 = vld [vmem:[%s2724_s18 + $0x50] sm:$0xff]   ;;  %v2204_v38 = vld [vmem:[%s2899_s0 + $0x8] sm:$0xff]   ;;  %v2214_v45 = vld [vmem:[%s2899_s0 + $0x18] sm:$0xff]   ;;  %s2339_s18 = sshll.u32 %s2439_s10, 4  ;;  %s2340_s18 = int_to_ptr.vmem [resolvable:$false] %s2339_s18 }
  0xad   : > { %1994 = vmatprep.subr.bf16.mxu0 %v2198_v10  ;;  %v1552_v51 = vld [vmem:[%s2904_s5] ss:$0 sm:$0xff]  ;;  %s2341_s27 = scalar_lea.vmem %s2340_s18, 3072  ;;  %p2342_p4 = scmp.lt.s32.totalorder %s2846_s20, %s2340_s18 }
  0xae   : > { %p2343_p9 = scmp.lt.s32.totalorder %s2341_s27, %s2335_s7 }
  0xaf   : > { %2035 = vmatpush3.bf16.msra.mxu1 %v2187_v4 }
  0xb0   : > { %2036 = vmatprep.subr.bf16.mxu1 %v2437_v0  ;;  %1995 = vmatpush3.bf16.msra.mxu0 %v2198_v10  ;;  %p2344_p5 = por %p2343_p9, %p2342_p4 }
  0xb1   : > { %1996 = vmatprep.subr.bf16.mxu0 %v2199_v16 }
  0xb2   : > { %p2345_p7 = pnand %p2344_p5, %p2338_p3 }
  0xb3   : > { %2037 = vmatpush3.bf16.msra.mxu1 %v2188_v7 }
  0xb4   : > { %2038 = vmatprep.subr.bf16.mxu1 %v2437_v0  ;;  %1997 = vmatpush3.bf16.msra.mxu0 %v2199_v16 }
  0xb5   : > { %1998 = vmatprep.subr.bf16.mxu0 %v2200_v17 }
  0xb7   : > { %2039 = vmatpush3.bf16.msra.mxu1 %v2189_v9 }
  0xb8   : > { %2040 = vmatprep.subr.bf16.mxu1 %v2437_v0  ;;  %1999 = vmatpush3.bf16.msra.mxu0 %v2200_v17 }
  0xb9   : > { %2000 = vmatprep.subr.bf16.mxu0 %v2201_v18 }
  0xbb   : > { %2041 = vmatpush3.bf16.msra.mxu1 %v2190_v11 }
  0xbc   : > { %2042 = vmatprep.subr.bf16.mxu1 %v2437_v0  ;;  %2001 = vmatpush3.bf16.msra.mxu0 %v2201_v18 }
  0xbd   : > { %2002 = vmatprep.subr.bf16.mxu0 %v2202_v19 }
  0xbf   : > { %2043 = vmatpush3.bf16.msra.mxu1 %v2191_v12 }
  0xc0   : > { %2003 = vmatpush3.bf16.msra.mxu0 %v2202_v19 }
  0xc2   : > { %2045 = vmatmul.mubr.bf16.vlgmr.msra.gmra.mrb[0].mxu1 %v2192_v13 }
  0xc3   : > { %2048 = vmatprep.mubr.msk.bf16.mxu1 %vm2438_vm0, %v2437_v0  ;;  %2005 = vmatmul.mubr.bf16.vlgmr.msra.gmra.mrb[0].mxu0 %v2206_v21 }
  0xc4   : > { %2008 = vmatprep.mubr.bf16.mxu0 %v2207_v22 }
  0xca   : > { %2049 = vmatmul.mubr.bf16.gmra.mrb[4].mxu1 %v2193_v14 }
  0xcb   : > { %2052 = vmatprep.mubr.msk.bf16.mxu1 %vm2438_vm0, %v2437_v0  ;;  %2009 = vmatmul.mubr.bf16.gmra.mrb[4].mxu0 %v2208_v23 }
  0xcc   : > { %2012 = vmatprep.mubr.bf16.mxu0 %v2209_v24 }
  0xd2   : > { %2053 = vmatmul.mubr.bf16.gmra.mrb[8].mxu1 %v2194_v15 }
  0xd3   : > { %2013 = vmatmul.mubr.bf16.gmra.mrb[8].mxu0 %v2210_v25  ;;  %2058 = vmatprep.mubr.msk.bf16.mxu1 %vm979_vm1, %v2203_v30 }
  0xd4   : > { %2016 = vmatprep.mubr.bf16.mxu0 %v2211_v26 }
  0xdb   : > { %2017 = vmatmul.mubr.bf16.gmra.mrb[12].mxu0 %v2213_v27 }
  0xdc   : > { %2020 = vmatprep.mubr.bf16.mxu0 %v2215_v28 }
  0xe3   : > { %2021 = vmatmul.mubr.bf16.gmra.mrb[16].mxu0 %v2216_v29 }
  0xe4   : > { %2024 = vmatprep.mubr.bf16.mxu0 %v2217_v31 }
  0xeb   : > { %2025 = vmatmul.mubr.bf16.gmra.mrb[20].mxu0 %v2218_v32 }
  0xec   : > { %2078 = vmatprep.mubr.msk.bf16.mxu0 %vm979_vm1, %v2203_v30 }
 0x195   : > { %v925_v33 = vpop.f32.mrb[0].mxu1 }
 0x196   : > { %v2046_v34 = vpop.f32.mrb[1].mxu1  ;;  %v2006_v52 = vpop.f32.mrb[0].mxu0 }
 0x197   : > { %v928_v35 = vpop.f32.mrb[2].mxu1  ;;  %v597_v53 = vadd.f32 %v2006_v52, %v1552_v51  ;;  %v588_v54 = vpop.f32.mrb[1].mxu0 }
 0x198   : > { %v948_v36 = vpack.c.bf16 %v928_v35, %v925_v33  ;;  %v2047_v37 = vpop.f32.mrb[3].mxu1  ;;  %v589_v55 = vadd.f32 %v1552_v51, %v588_v54  ;;  %v2007_v56 = vpop.f32.mrb[2].mxu0 }
 0x199   : > { %v600_v57 = vadd.f32 %v2007_v56, %v1552_v51  ;;  %v591_v58 = vpop.f32.mrb[3].mxu0 }
 0x19a   : > { %2056 = vmatprep.subr.bf16.mxu1 %v948_v36  ;;  %v592_v59 = vadd.f32 %v1552_v51, %v591_v58 }
 0x19b   : > { %2057 = vmatpush3.bf16.msra.mxu1 %v948_v36  ;;  %v1746_v60 = vpack.c.bf16 %v600_v57, %v597_v53 }
 0x19c   : > { %v2783_v61 = vpack.c.bf16 %v592_v59, %v589_v55 }
 0x19d   : > { %v933_v40 = vpop.f32.mrb[4].mxu1  ;;  %v1805_v54 = vunpack.c.h.bf16 %v1746_v60 }
 0x19e   : > { %v2050_v41 = vpop.f32.mrb[5].mxu1  ;;  %2059 = vmatmul.mubr.msk.bf16.vlgmr.msra.gmra.mrb[12].mxu1 %vm979_vm1, %v2204_v38  ;;  %v2010_v62 = vpop.f32.mrb[4].mxu0  ;;  %v1801_v57 = vunpack.c.h.bf16 %v2783_v61 }
 0x19f   : > { %v936_v42 = vpop.f32.mrb[6].mxu1  ;;  %2062 = vmatprep.mubr.msk.bf16.mxu1 %vm979_vm1, %v2212_v39  ;;  %v613_v63 = vadd.f32 %v2010_v62, %v1552_v51  ;;  %v604_v0 = vpop.f32.mrb[5].mxu0 }
 0x1a0   : > { %v949_v43 = vpack.c.bf16 %v936_v42, %v933_v40  ;;  %v2051_v44 = vpop.f32.mrb[7].mxu1  ;;  %v605_v1 = vadd.f32 %v1552_v51, %v604_v0  ;;  %v2011_v2 = vpop.f32.mrb[6].mxu0 }
 0x1a1   : > { %v616_v3 = vadd.f32 %v2011_v2, %v1552_v51  ;;  %v607_v4 = vpop.f32.mrb[7].mxu0 }
 0x1a2   : > { %2066 = vmatprep.subr.bf16.mxu1 %v949_v43  ;;  %v608_v5 = vadd.f32 %v1552_v51, %v607_v4 }
 0x1a3   : > { %2067 = vmatpush3.bf16.msra.mxu1 %v949_v43  ;;  %v2785_v6 = vpack.c.bf16 %v616_v3, %v613_v63 }
 0x1a4   : > { %v2787_v7 = vpack.c.bf16 %v608_v5, %v605_v1 }
 0x1a5   : > { %v941_v46 = vpop.f32.mrb[8].mxu1  ;;  %v1812_v0 = vunpack.c.l.bf16 %v2785_v6  ;;  %v1813_v3 = vunpack.c.h.bf16 %v2785_v6 }
 0x1a6   : > { %v2054_v47 = vpop.f32.mrb[9].mxu1  ;;  %2063 = vmatmul.mubr.msk.bf16.gmra.mrb[16].mxu1 %vm979_vm1, %v2214_v45  ;;  %v2014_v8 = vpop.f32.mrb[8].mxu0  ;;  %v1808_v1 = vunpack.c.l.bf16 %v2787_v7 }
 0x1a7   : > { %v944_v48 = vpop.f32.mrb[10].mxu1  ;;  %2068 = vmatprep.mubr.msk.bf16.mxu1 %vm979_vm1, %v2203_v30  ;;  %v620_v9 = vpop.f32.mrb[9].mxu0  ;;  %v629_v12 = vadd.f32 %v2014_v8, %v1552_v51  ;;  %v1809_v8 = vunpack.c.h.bf16 %v2787_v7 }
 0x1a8   : > { %v950_v49 = vpack.c.bf16 %v944_v48, %v941_v46  ;;  %v2055_v50 = vpop.f32.mrb[11].mxu1  ;;  %v2015_v10 = vpop.f32.mrb[10].mxu0  ;;  %v621_v13 = vadd.f32 %v1552_v51, %v620_v9  ;;  %v1804_v48 = vunpack.c.l.bf16 %v1746_v60 }
 0x1a9   : > { %v623_v11 = vpop.f32.mrb[11].mxu0  ;;  %v632_v14 = vadd.f32 %v2015_v10, %v1552_v51  ;;  %v1800_v50 = vunpack.c.l.bf16 %v2783_v61 }
 0x1aa   : > { %2076 = vmatprep.subr.bf16.mxu0 %v950_v49  ;;  %v624_v15 = vadd.f32 %v1552_v51, %v623_v11 }
 0x1ab   : > { %2077 = vmatpush3.bf16.msra.mxu0 %v950_v49  ;;  %v2789_v16 = vpack.c.bf16 %v632_v14, %v629_v12 }
 0x1ac   : > { %v2791_v17 = vpack.c.bf16 %v624_v15, %v621_v13 }
 0x1ad   : > { %v1840_v14 = vunpack.c.l.bf16 %v2789_v16  ;;  %v1841_v7 = vunpack.c.h.bf16 %v2789_v16 }
 0x1ae   : > { %2069 = vmatmul.mubr.msk.bf16.vlgmr.msra.gmra.mrb[20].mxu1 %vm979_vm1, %v2204_v38  ;;  %2079 = vmatmul.mubr.msk.bf16.vlgmr.msra.gmra.mrb[24].mxu0 %vm979_vm1, %v2204_v38  ;;  %v2018_v18 = vpop.f32.mrb[12].mxu0 }
 0x1af   : > { %2072 = vmatprep.mubr.msk.bf16.mxu1 %vm979_vm1, %v2212_v39  ;;  %2082 = vmatprep.mubr.msk.bf16.mxu0 %vm979_vm1, %v2212_v39  ;;  %v636_v19 = vpop.f32.mrb[13].mxu0  ;;  %v645_v22 = vadd.f32 %v2018_v18, %v1552_v51 }
 0x1b0   : > { %v2019_v20 = vpop.f32.mrb[14].mxu0  ;;  %v637_v23 = vadd.f32 %v1552_v51, %v636_v19  ;;  %v1836_v19 = vunpack.c.l.bf16 %v2791_v17 }
 0x1b1   : > { %v639_v21 = vpop.f32.mrb[15].mxu0  ;;  %v648_v24 = vadd.f32 %v2019_v20, %v1552_v51 }
 0x1b2   : > { %v640_v25 = vadd.f32 %v1552_v51, %v639_v21 }
 0x1b3   : > { %v2793_v26 = vpack.c.bf16 %v648_v24, %v645_v22 }
 0x1b4   : > { %v2795_v27 = vpack.c.bf16 %v640_v25, %v637_v23 }
 0x1b6   : > { %2073 = vmatmul.mubr.msk.bf16.gmra.mrb[24].mxu1 %vm979_vm1, %v2214_v45  ;;  %2083 = vmatmul.mubr.msk.bf16.gmra.mrb[28].mxu0 %vm979_vm1, %v2214_v45  ;;  %v2022_v28 = vpop.f32.mrb[16].mxu0 }
 0x1b7   : > { %v652_v29 = vpop.f32.mrb[17].mxu0  ;;  %v661_v32 = vadd.f32 %v2022_v28, %v1552_v51 }
 0x1b8   : > { %v2023_v30 = vpop.f32.mrb[18].mxu0  ;;  %v653_v33 = vadd.f32 %v1552_v51, %v652_v29 }
 0x1b9   : > { %v655_v31 = vpop.f32.mrb[19].mxu0  ;;  %v664_v34 = vadd.f32 %v2023_v30, %v1552_v51  ;;  %v1837_v30 = vunpack.c.h.bf16 %v2791_v17  ;;  %v1848_v17 = vunpack.c.l.bf16 %v2793_v26 }
 0x1ba   : > { %v656_v35 = vadd.f32 %v1552_v51, %v655_v31 }
 0x1bb   : > { %v2797_v36 = vpack.c.bf16 %v664_v34, %v661_v32 }
 0x1bc   : > { %v2799_v37 = vpack.c.bf16 %v656_v35, %v653_v33 }
 0x1bd   : > { %v1876_v15 = vunpack.c.l.bf16 %v2797_v36  ;;  %v1877_v25 = vunpack.c.h.bf16 %v2797_v36 }
 0x1be   : > { %v2026_v38 = vpop.f32.mrb[20].mxu0  ;;  %v1872_v6 = vunpack.c.l.bf16 %v2799_v37  ;;  %v1873_v33 = vunpack.c.h.bf16 %v2799_v37 }
 0x1bf   : > { %v668_v39 = vpop.f32.mrb[21].mxu0  ;;  %v677_v42 = vadd.f32 %v2026_v38, %v1552_v51 }
 0x1c0   : > { %v2027_v40 = vpop.f32.mrb[22].mxu0  ;;  %v669_v43 = vadd.f32 %v1552_v51, %v668_v39 }
 0x1c1   : > { %v671_v41 = vpop.f32.mrb[23].mxu0  ;;  %v680_v44 = vadd.f32 %v2027_v40, %v1552_v51 }
 0x1c2   : > { %v672_v45 = vadd.f32 %v1552_v51, %v671_v41 }
 0x1c3   : > { %v2801_v46 = vpack.c.bf16 %v680_v44, %v677_v42 }
 0x1c4   : > { %v2803_v47 = vpack.c.bf16 %v672_v45, %v669_v43  ;;  %v1844_v45 = vunpack.c.l.bf16 %v2795_v27 }
 0x1c5   : > { %v1884_v44 = vunpack.c.l.bf16 %v2801_v46 }
 0x271   : > { %v2060_v49 = vpop.f32.mrb[12].mxu1 }
 0x272   : > { %v1075_v52 = vadd.f32 %v2060_v49, %v1804_v48  ;;  %v1026_v53 = vpop.f32.mrb[13].mxu1  ;;  %v1880_v49 = vunpack.c.l.bf16 %v2803_v47 }
 0x273   : > { %v1073_v55 = vadd.f32 %v1800_v50, %v1026_v53  ;;  %v2061_v56 = vpop.f32.mrb[14].mxu1  ;;  %v1849_v53 = vunpack.c.h.bf16 %v2793_v26 }
 0x274   : > { %v1076_v58 = vadd.f32 %v2061_v56, %v1805_v54  ;;  %v1029_v59 = vpop.f32.mrb[15].mxu1  ;;  %v1885_v56 = vunpack.c.h.bf16 %v2801_v46 }
 0x275   : > { %v1074_v62 = vadd.f32 %v1801_v57, %v1029_v59  ;;  %v1845_v59 = vunpack.c.h.bf16 %v2795_v27 }
 0x276   : > { %v1822_v51 = vpack.c.bf16 %v1076_v58, %v1075_v52 }
 0x277   : > { %v1817_v63 = vpack.c.bf16 %v1074_v62, %v1073_v55 }
 0x278   : > { %1922 = vst [vmem:[%s2809_s14 + $0x8] sm:$0xff] %v1822_v51  }
 0x279   : > { %1818 = vst [vmem:[%s2809_s14] sm:$0xff] %v1817_v63   ;;  %v2064_v60 = vpop.f32.mrb[16].mxu1  ;;  %v1881_v63 = vunpack.c.h.bf16 %v2803_v47 }
 0x27a   : > { %v1079_v61 = vadd.f32 %v2064_v60, %v1812_v0  ;;  %v1042_v2 = vpop.f32.mrb[17].mxu1 }
 0x27b   : > { %v1077_v4 = vadd.f32 %v1808_v1, %v1042_v2  ;;  %v2065_v5 = vpop.f32.mrb[18].mxu1 }
 0x27c   : > { %v1080_v9 = vadd.f32 %v2065_v5, %v1813_v3  ;;  %v1045_v10 = vpop.f32.mrb[19].mxu1 }
 0x27d   : > { %v1078_v11 = vadd.f32 %v1809_v8, %v1045_v10 }
 0x27e   : > { %v1832_v12 = vpack.c.bf16 %v1080_v9, %v1079_v61 }
 0x27f   : > { %v1827_v13 = vpack.c.bf16 %v1078_v11, %v1077_v4 }
 0x280   : > { %1924 = vst [vmem:[%s2809_s14 + $0x18] sm:$0xff] %v1832_v12  }
 0x281   : > { %1923 = vst [vmem:[%s2809_s14 + $0x10] sm:$0xff] %v1827_v13   ;;  %v2070_v18 = vpop.f32.mrb[20].mxu1  ;;  %v2080_v20 = vpop.f32.mrb[24].mxu0 }
 0x282   : > { %v1205_v21 = vadd.f32 %v2070_v18, %v1840_v14  ;;  %v1155_v22 = vpop.f32.mrb[21].mxu1  ;;  %v1335_v23 = vadd.f32 %v2080_v20, %v1876_v15  ;;  %v1285_v24 = vpop.f32.mrb[25].mxu0 }
 0x283   : > { %v1203_v28 = vadd.f32 %v1836_v19, %v1155_v22  ;;  %v2071_v29 = vpop.f32.mrb[22].mxu1  ;;  %v1333_v31 = vadd.f32 %v1872_v6, %v1285_v24  ;;  %v2081_v32 = vpop.f32.mrb[26].mxu0 }
 0x284   : > { %v1206_v34 = vadd.f32 %v2071_v29, %v1841_v7  ;;  %v1158_v35 = vpop.f32.mrb[23].mxu1  ;;  %v1336_v38 = vadd.f32 %v2081_v32, %v1877_v25  ;;  %v1288_v16 = vpop.f32.mrb[27].mxu0 }
 0x285   : > { %v1204_v39 = vadd.f32 %v1837_v30, %v1158_v35  ;;  %v1334_v40 = vadd.f32 %v1873_v33, %v1288_v16 }
 0x286   : > { %v1858_v41 = vpack.c.bf16 %v1206_v34, %v1205_v21  ;;  %v1894_v36 = vpack.c.bf16 %v1336_v38, %v1335_v23 }
 0x287   : > { %v1853_v42 = vpack.c.bf16 %v1204_v39, %v1203_v28  ;;  %v1889_v43 = vpack.c.bf16 %v1334_v40, %v1333_v31 }
 0x288   : > { %1930 = vst [vmem:[%s2809_s14 + $0x28] sm:$0xff] %v1858_v41   ;;  %1938 = vst [vmem:[%s2809_s14 + $0x48] sm:$0xff] %v1894_v36  }
 0x289   : > { %1929 = vst [vmem:[%s2809_s14 + $0x20] sm:$0xff] %v1853_v42   ;;  %v2074_v37 = vpop.f32.mrb[24].mxu1  ;;  %1937 = vst [vmem:[%s2809_s14 + $0x40] sm:$0xff] %v1889_v43   ;;  %v2084_v48 = vpop.f32.mrb[28].mxu0 }
 0x28a   : > { %v1209_v50 = vadd.f32 %v2074_v37, %v1848_v17  ;;  %v1171_v52 = vpop.f32.mrb[25].mxu1  ;;  %v1339_v54 = vadd.f32 %v2084_v48, %v1884_v44  ;;  %v1301_v55 = vpop.f32.mrb[29].mxu0 }
 0x28b   : > { %v1207_v57 = vadd.f32 %v1844_v45, %v1171_v52  ;;  %v2075_v58 = vpop.f32.mrb[26].mxu1  ;;  %v1337_v62 = vadd.f32 %v1880_v49, %v1301_v55  ;;  %v2085_v51 = vpop.f32.mrb[30].mxu0 }
 0x28c   : > { %v1210_v0 = vadd.f32 %v2075_v58, %v1849_v53  ;;  %v1174_v26 = vpop.f32.mrb[27].mxu1  ;;  %v1340_v60 = vadd.f32 %v2085_v51, %v1885_v56  ;;  %v1304_v1 = vpop.f32.mrb[31].mxu0 }
 0x28d   : > { %v1208_v46 = vadd.f32 %v1845_v59, %v1174_v26  ;;  %v1338_v61 = vadd.f32 %v1881_v63, %v1304_v1 }
 0x28e   : > { %v1868_v2 = vpack.c.bf16 %v1210_v0, %v1209_v50  ;;  %v1904_v3 = vpack.c.bf16 %v1340_v60, %v1339_v54 }
 0x28f   : > { %v1863_v27 = vpack.c.bf16 %v1208_v46, %v1207_v57  ;;  %v1899_v47 = vpack.c.bf16 %v1338_v61, %v1337_v62 }
 0x290   : > { %1932 = vst [vmem:[%s2809_s14 + $0x38] sm:$0xff] %v1868_v2   ;;  %1940 = vst [vmem:[%s2809_s14 + $0x58] sm:$0xff] %v1904_v3  }
 0x291   : > { %1931 = vst [vmem:[%s2809_s14 + $0x30] sm:$0xff] %v1863_v27   ;;  %1939 = vst [vmem:[%s2809_s14 + $0x50] sm:$0xff] %v1899_v47  }
 0x292   : > { %2348 = shalt.err (!%p2345_p7)
}
 0x293   : > { %s2349_s29 = scalar_lea.hbm %s2844_s17, 1536  ;;  %s2353_s28 = scalar_lea.hbm %s2905_s6, 3072 }
 0x294   : > { %p2350_p11 = scmp.ne.s32.totalorder %s2844_s17, %s2349_s29  ;;  %p2354_p12 = scmp.lt.u32.totalorder %s2844_s17, %s2905_s6 }
 0x295   : > { %p2355_p13 = scmp.lt.u32.totalorder %s2353_s28, %s2349_s29  ;;  %p2357_p2 = scmp.lt.u32.totalorder %s2349_s29, %s2844_s17 }
 0x296   : > { %p2351_p1 = pnand %p2350_p11, %p2938_p6 }
 0x297   : > { %p2356_p0 = por %p2355_p13, %p2354_p12 }
 0x298   : > { %p2352_p8 = pneg %p2351_p1 }
 0x299   : > { %p2358_p10 = por %p2357_p2, %p2356_p0 }
 0x29b   : > { %p2359_p3 = pnand %p2358_p10, %p2352_p8 }
 0x29d   : > { %2362 = shalt.err (!%p2359_p3)
}
 0x29e   : > { %s2440_s13 = smov 64   ;;  %s2441_s4 = smov 4  }
 0x29f   : > { %2102 = dma.vmem_to_hbm [thread:$0]  (%p2938_p6), %s2846_s20, 1536, %s2844_s17, %s1382_s1, %s2440_s13, %s2440_s13, %s2441_s4  }
 0x2a0 PF: > { %s1412_s9 = sand.u32 1, %s2409_s21   ;;  %p2939_p4 = scmp.ne.s32.totalorder %s2920_s30, 0 }
 0x2a1   : > { %p2940_p9 = scmp.ge.s32.totalorder %s2429_s26, 2  ;;  %s1413_s14 = scalar_lea.sflag [#allocation4], %s1412_s9 }
 0x2a3   : > { %p2119_p5 = pnand %p2940_p9, %p2939_p4 }
 0x2a5   : > { %2404 = dma.done.wait (!%p2119_p5), %s1413_s14, 1536  }
 0x2a6   : > { %2406 = vsyncadd (!%p2119_p5), %s1413_s14, 4294965760  ;;  %s26_s26 = sadd.s32 1, %s2429_s26   ;;  %s2941_s12 = sld [smem:[#allocation16_spill]] }
 0x2a7   : > { %p23_p7 = scmp.ge.s32.totalorder %s26_s26, 4   ;;  %s2942_s23 = sld [smem:[#allocation18_spill]] }
 0x2a8   : > { %s2943_s15 = sld [smem:[#allocation17_spill]]  ;;  %s2944_s21 = smov %s2413_s22 }
 0x2a9   : > { %s2946_s24 = smov %s2425_s25  ;;  %25 = sbr.rel (!%p23_p7) target bundleno = 13 (0xd), region = 117 }
 0x2ac   : > { %s2945_s22 = smov %s2941_s12 }
 0x2ae   : > { %s2947_s25 = smov %s2943_s15 }
 0x2b0   :  { %1418 = vsyncpa [#allocation3], 1 }
 0x2b1   :  { %1420 = vsyncpa [#allocation3 + $0x1], 1 }
 0x2b2   :  { %1421 = vsyncpa [#allocation6], 1 }
 0x2b3   :  { %1423 = vsyncpa [#allocation6 + $0x1], 1 }
 0x2b4   :  { %1424 = vsyncpa [#allocation9], 1 }
 0x2b5   :  { %1425 = vsyncpa [#allocation4], 1 }
 0x2b6   :  { %1427 = vsyncpa [#allocation4 + $0x1], 1 }

</bundles_post_ra>
